<compile_context>
chip_gen: v5e
topology: v5e:2x2
jax: 0.10.0
libtpu: 0.0.40
codegen_flags: <defaults>
</compile_context>

<pallas_src>
import functools

import numpy as np
import jax
import jax.numpy as jnp
from jax.experimental import pallas as pl
from jax.experimental.pallas import tpu as pltpu


def _round_up(a, b):
    return -(-a // b) * b


def _largest_divisor_at_most(n, cap):
    cap = max(1, min(n, cap))
    for d in range(cap, 0, -1):
        if n % d == 0:
            return d
    return 1


def _sublane_multiple(itemsize):
    # f32 tile is (8,128); sub-32-bit dtypes pack along sublanes.
    return {4: 8, 2: 16, 1: 32}.get(int(itemsize), 8)


def _padded_tile_bytes(shape, itemsize):
    # True VMEM footprint of a block: last two dims padded to the hardware tile.
    dims = list(shape)
    dims[-1] = _round_up(dims[-1], 128)
    dims[-2] = _round_up(dims[-2], _sublane_multiple(itemsize))
    total = int(itemsize)
    for d in dims:
        total *= int(d)
    return total


def _sharpen_conv_kernel(x_ref, m_ref, o_ref, *, groups):
    # x_ref: (nb, C, hh, s*Wp)  row-pair view of the input batch block (VMEM)
    # m_ref: (G, Wp, w_out)     baked per-(channel, dh, row-phase) gather/weight mats
    # o_ref: (nb, h_out, w_out) single output channel
    nb, h_out, _ = o_ref.shape
    wp = m_ref.shape[1]
    for b in range(nb):  # static unroll; nb is kept small (<= 16)
        acc = None
        for g, (cc, dh, ph) in enumerate(groups):
            xc = x_ref[b, cc]                                     # (hh, s*Wp)
            # Row window + row-phase pick are plain contiguous slices of the value.
            slab = xc[dh:dh + h_out, ph * wp:(ph + 1) * wp].astype(jnp.float32)
            # One MXU matmul per group folds the stride-s column pick and the kw
            # weights (MXU is idle anyway: the kernel is HBM-bandwidth bound).
            part = jnp.dot(slab, m_ref[g],
                           preferred_element_type=jnp.float32,
                           precision=jax.lax.Precision.HIGHEST)
            acc = part if acc is None else acc + part
        o_ref[b] = acc.astype(o_ref.dtype)


def sharpen_conv(x, weight, *, stride=2, padding=0):
    """F.conv2d(x, weight, bias=None, stride=stride, padding=padding), out_channels=1.

    `weight` is the module's fixed (1, C, kh, kw) buffer and must be concrete
    (non-traced): it is baked into per-group gather/weight matrices at trace time
    so structurally-zero taps cost nothing.
    """
    n, c, h, w = x.shape
    try:
        w_np = np.asarray(jax.device_get(weight), dtype=np.float32)
    except Exception as e:  # e.g. traced weight under jit/grad
        raise ValueError("sharpen_conv bakes the fixed conv kernel at trace time; "
                         "`weight` must be a concrete (non-traced) array.") from e
    assert w_np.ndim == 4 and w_np.shape[0] == 1 and w_np.shape[1] == c
    kh_sz, kw_sz = int(w_np.shape[2]), int(w_np.shape[3])
    s = int(stride)

    if padding:
        x = jnp.pad(x, ((0, 0), (0, 0), (padding, padding), (padding, padding)))
    hp = h + 2 * padding
    wp = w + 2 * padding
    h_out = (hp - kh_sz) // s + 1
    w_out = (wp - kw_sz) // s + 1
    assert h_out > 0 and w_out > 0, "input too small for the conv window"

    # Row-pair ("space-to-depth along H only") view: a free row-major reshape, so
    # the kernel's BlockSpec DMA is the only HBM read of the input.
    hh = -(-hp // s)
    if hh * s != hp:  # only when Hp is not a stride multiple
        x = jnp.pad(x, ((0, 0), (0, 0), (0, hh * s - hp), (0, 0)))
    xr = x.reshape(n, c, hh, s * wp)

    # Bake the fixed weights: one (Wp, w_out) matrix per (channel, dh=kh//s,
    # phase=kh%s) group with M[s*j + kw, j] += w[c, kh, kw].  22 of 27 sharpen taps
    # are structurally zero, so only 3 groups / 5 taps survive.
    group_mats = {}
    for cc in range(c):
        for kh in range(kh_sz):
            dh, ph = kh // s, kh % s
            for kw in range(kw_sz):
                wgt = float(w_np[0, cc, kh, kw])
                if wgt == 0.0:
                    continue
                m = group_mats.setdefault((cc, dh, ph),
                                          np.zeros((wp, w_out), np.float32))
                m[s * np.arange(w_out) + kw, np.arange(w_out)] += wgt
    if not group_mats:
        return jnp.zeros((n, 1, h_out, w_out), x.dtype)
    groups = tuple(sorted(group_mats))
    mats = jnp.asarray(np.stack([group_mats[k] for k in groups], axis=0))
    num_groups = len(groups)

    # ---- VMEM / block sizing with (8,128)-tile-padded bytes --------------------
    itemsize = x.dtype.itemsize
    in_img_bytes = c * _padded_tile_bytes((hh, s * wp), itemsize)
    out_img_bytes = _padded_tile_bytes((h_out, w_out), itemsize)
    mat_bytes = num_groups * _padded_tile_bytes((wp, w_out), 4)

    try:
        vmem_cap = int(getattr(pltpu.get_tpu_info(), "vmem_capacity_bytes",
                               64 * 1024 * 1024))
    except Exception:
        vmem_cap = 64 * 1024 * 1024            # conservative (v7x per-TC VMEM)
    vmem_budget = (vmem_cap * 3) // 4          # headroom for compiler scratch/sems

    # Batch blocking: target a few-MiB block (amortizes ~0.35us/step overhead) but
    # (a) keep >= 2 grid blocks when n >= 2 so both v7x TensorCores get work,
    # (b) bound the static per-image unroll, (c) pick a divisor of n -> no padding.
    max_block_bytes = min(vmem_budget // 3, 16 * 1024 * 1024)
    per_img_bytes = in_img_bytes + out_img_bytes
    nb_cap = max(1, max_block_bytes // max(per_img_bytes, 1))
    nb_cap = min(nb_cap, 16)
    if n >= 2:
        nb_cap = min(nb_cap, max(1, n // 2))
    nb = _largest_divisor_at_most(n, nb_cap)
    # TODO(synk): a single image larger than the VMEM budget (e.g. 4K inputs) needs
    # an extra H grid axis with a one-row-pair halo; not implemented here.

    need = 2 * nb * per_img_bytes + 2 * mat_bytes + (2 << 20)
    vmem_limit = int(min(vmem_budget, max(need, 32 * 1024 * 1024)))

    cost = pl.CostEstimate(
        flops=int(2 * n * num_groups * h_out * wp * w_out),
        transcendentals=0,
        bytes_accessed=int(xr.size * itemsize + mats.size * 4
                           + n * h_out * w_out * itemsize),
    )

    kernel = functools.partial(_sharpen_conv_kernel, groups=groups)

    # TODO(synk): the output block's lane dim is w_out (<128 for typical images) so
    # stores are masked vst; a lane-dense repack would need an extra pass over the
    # (small) output or an in-kernel relayout — skipped for lowering safety.
    out = pl.pallas_call(
        kernel,
        out_shape=jax.ShapeDtypeStruct((n, h_out, w_out), x.dtype),
        grid=(n // nb,),
        in_specs=[
            pl.BlockSpec((nb, c, hh, s * wp), lambda i: (i, 0, 0, 0)),
            pl.BlockSpec((num_groups, wp, w_out), lambda i: (0, 0, 0)),
        ],
        out_specs=pl.BlockSpec((nb, h_out, w_out), lambda i: (i, 0, 0)),
        compiler_params=pltpu.CompilerParams(
            dimension_semantics=("parallel",),   # batch blocks are independent
            vmem_limit_bytes=vmem_limit,
        ),
        cost_estimate=cost,
    )(xr, mats)

    return out.reshape(n, 1, h_out, w_out)


def make_sharpen_weight(in_channels=3):
    # Mirrors SharpenConv.__init__ (uninitialized rows replaced by zeros).
    sharpen = np.zeros((1, in_channels, 3, 3), dtype=np.float32)
    sharpen[0, :, 2] = np.array([[0, -1, 0], [-1, 5, -1], [0, -1, 0]],
                                dtype=np.float32)
    return sharpen


if __name__ == "__main__":
    key = jax.random.PRNGKey(0)
    in_channels = 3  # __init__'s broadcast assignment implies in_channels == 3
    x = jax.random.normal(key, (2, in_channels, 16, 16), dtype=jnp.float32)
    weight = make_sharpen_weight(in_channels)

    out = jax.block_until_ready(sharpen_conv(x, weight, stride=2, padding=0))
    assert out.shape == (2, 1, 7, 7), out.shape

    # Reference: XLA conv with PyTorch NCHW/OIHW conventions.
    ref = jax.lax.conv_general_dilated(
        x, jnp.asarray(weight),
        window_strides=(2, 2),
        padding=[(0, 0), (0, 0)],
        dimension_numbers=("NCHW", "OIHW", "NCHW"),
    )
    if not np.allclose(np.asarray(out), np.asarray(ref), atol=1e-5, rtol=1e-5):
        raise AssertionError("Pallas SharpenConv does not match reference conv2d")

    print("KERNEL_OK")
</pallas_src>

<mosaic_0001>
module attributes {stable_mosaic.version = 11 : i64} {
  func.func @_sharpen_conv_kernel(%arg0: i32, %arg1: memref<1x3x8x32xf32, #tpu.memory_space<vmem>>, %arg2: memref<3x16x7xf32, #tpu.memory_space<vmem>>, %arg3: memref<1x7x7xf32, #tpu.memory_space<vmem>>) attributes {dimension_semantics = [#tpu.dimension_semantics<parallel>], iteration_bounds = array<i64: 2>, scalar_prefetch = 0 : i64, scratch_operands = 0 : i64, tpu.core_type = #tpu.core_type<tc>, window_params = [{transform_indices = @transform_0, window_bounds = array<i64: 1, 3, 8, 32>}, {pipeline_mode = #tpu.pipeline_mode<synchronous>, transform_indices = @transform_1, window_bounds = array<i64: 3, 16, 7>}, {transform_indices = @transform_2, window_bounds = array<i64: 1, 7, 7>}]} {
    %c0 = arith.constant 0 : index
    %c0_0 = arith.constant 0 : index
    %c0_1 = arith.constant 0 : index
    %c0_2 = arith.constant 0 : index
    %0 = vector.load %arg1[%c0, %c0_0, %c0_1, %c0_2] : memref<1x3x8x32xf32, #tpu.memory_space<vmem>>, vector<1x1x8x32xf32>
    %1 = vector.shape_cast %0 : vector<1x1x8x32xf32> to vector<8x32xf32>
    %2 = vector.extract_strided_slice %1 {offsets = [1, 0], sizes = [7, 16], strides = [1, 1]} : vector<8x32xf32> to vector<7x16xf32>
    %c0_3 = arith.constant 0 : index
    %c0_4 = arith.constant 0 : index
    %c0_5 = arith.constant 0 : index
    %3 = vector.load %arg2[%c0_3, %c0_4, %c0_5] : memref<3x16x7xf32, #tpu.memory_space<vmem>>, vector<1x16x7xf32>
    %4 = vector.shape_cast %3 : vector<1x16x7xf32> to vector<16x7xf32>
    %cst = arith.constant dense<0.000000e+00> : vector<7x7xf32>
    %5 = tpu.matmul %2, %4, %cst {dimension_numbers = #tpu.dot_dimension_numbers<[1], [0], [0], [1], [0, 0, 1, 1], [], []>, precision = #tpu.contract_precision<fp32>} : vector<7x16xf32>, vector<16x7xf32>, vector<7x7xf32> -> vector<7x7xf32>
    %c0_6 = arith.constant 0 : index
    %c1 = arith.constant 1 : index
    %c0_7 = arith.constant 0 : index
    %c0_8 = arith.constant 0 : index
    %6 = vector.load %arg1[%c0_6, %c1, %c0_7, %c0_8] : memref<1x3x8x32xf32, #tpu.memory_space<vmem>>, vector<1x1x8x32xf32>
    %7 = vector.shape_cast %6 : vector<1x1x8x32xf32> to vector<8x32xf32>
    %8 = vector.extract_strided_slice %7 {offsets = [1, 0], sizes = [7, 16], strides = [1, 1]} : vector<8x32xf32> to vector<7x16xf32>
    %c1_9 = arith.constant 1 : index
    %c0_10 = arith.constant 0 : index
    %c0_11 = arith.constant 0 : index
    %9 = vector.load %arg2[%c1_9, %c0_10, %c0_11] : memref<3x16x7xf32, #tpu.memory_space<vmem>>, vector<1x16x7xf32>
    %10 = vector.shape_cast %9 : vector<1x16x7xf32> to vector<16x7xf32>
    %cst_12 = arith.constant dense<0.000000e+00> : vector<7x7xf32>
    %11 = tpu.matmul %8, %10, %cst_12 {dimension_numbers = #tpu.dot_dimension_numbers<[1], [0], [0], [1], [0, 0, 1, 1], [], []>, precision = #tpu.contract_precision<fp32>} : vector<7x16xf32>, vector<16x7xf32>, vector<7x7xf32> -> vector<7x7xf32>
    %12 = arith.addf %5, %11 : vector<7x7xf32>
    %c0_13 = arith.constant 0 : index
    %c2 = arith.constant 2 : index
    %c0_14 = arith.constant 0 : index
    %c0_15 = arith.constant 0 : index
    %13 = vector.load %arg1[%c0_13, %c2, %c0_14, %c0_15] : memref<1x3x8x32xf32, #tpu.memory_space<vmem>>, vector<1x1x8x32xf32>
    %14 = vector.shape_cast %13 : vector<1x1x8x32xf32> to vector<8x32xf32>
    %15 = vector.extract_strided_slice %14 {offsets = [1, 0], sizes = [7, 16], strides = [1, 1]} : vector<8x32xf32> to vector<7x16xf32>
    %c2_16 = arith.constant 2 : index
    %c0_17 = arith.constant 0 : index
    %c0_18 = arith.constant 0 : index
    %16 = vector.load %arg2[%c2_16, %c0_17, %c0_18] : memref<3x16x7xf32, #tpu.memory_space<vmem>>, vector<1x16x7xf32>
    %17 = vector.shape_cast %16 : vector<1x16x7xf32> to vector<16x7xf32>
    %cst_19 = arith.constant dense<0.000000e+00> : vector<7x7xf32>
    %18 = tpu.matmul %15, %17, %cst_19 {dimension_numbers = #tpu.dot_dimension_numbers<[1], [0], [0], [1], [0, 0, 1, 1], [], []>, precision = #tpu.contract_precision<fp32>} : vector<7x16xf32>, vector<16x7xf32>, vector<7x7xf32> -> vector<7x7xf32>
    %19 = arith.addf %12, %18 : vector<7x7xf32>
    %c0_20 = arith.constant 0 : index
    %c0_21 = arith.constant 0 : index
    %c0_22 = arith.constant 0 : index
    %20 = vector.load %arg3[%c0_20, %c0_21, %c0_22] : memref<1x7x7xf32, #tpu.memory_space<vmem>>, vector<1x7x7xf32>
    %21 = vector.shape_cast %20 : vector<1x7x7xf32> to vector<7x7xf32>
    %22 = vector.shape_cast %19 : vector<7x7xf32> to vector<1x7x7xf32>
    tpu.vector_store %arg3[%c0_20, %c0_21, %c0_22], %22 {strides = array<i32>} : memref<1x7x7xf32, #tpu.memory_space<vmem>>, vector<1x7x7xf32>,
    return
  }
  func.func @transform_0(%arg0: i32) -> (i32, i32, i32, i32) {
    %c0_i32 = arith.constant 0 : i32
    %c0_i32_0 = arith.constant 0 : i32
    %c0_i32_1 = arith.constant 0 : i32
    %c0_i32_2 = arith.constant 0 : i32
    return %arg0, %c0_i32, %c0_i32_0, %c0_i32_1 : i32, i32, i32, i32
  }
  func.func @transform_1(%arg0: i32) -> (i32, i32, i32) {
    %c0_i32 = arith.constant 0 : i32
    %c0_i32_0 = arith.constant 0 : i32
    %c0_i32_1 = arith.constant 0 : i32
    %c0_i32_2 = arith.constant 0 : i32
    return %c0_i32, %c0_i32_0, %c0_i32_1 : i32, i32, i32
  }
  func.func @transform_2(%arg0: i32) -> (i32, i32, i32) {
    %c0_i32 = arith.constant 0 : i32
    %c0_i32_0 = arith.constant 0 : i32
    %c0_i32_1 = arith.constant 0 : i32
    return %arg0, %c0_i32, %c0_i32_0 : i32, i32, i32
  }
}

</mosaic_0001>

<bundles_post_ra>
// kernel: tpu_custom_call.1
= control target key start
LH: loop header
LB: loop body
LE: loop exit
PB: predicated region body
PF: predicated region fallthrough
CT: control target
= control target key end

     0   :  { %s748_s9 = smov 0   ;;  %s845_s0 = inlined_call_operand.vmem [shape: f32[2,3,8,32], index: 0, kind: input, shape index: {}]   ;;  %s846_s1 = inlined_call_operand.vmem [shape: f32[3,16,7], index: 1, kind: input, shape index: {}]   ;;  %s847_s2 = inlined_call_operand.vmem [shape: f32[2,7,7], index: 2, kind: output, shape index: {}]  }
   0x1 LB: > { %s701_s10 = sadd.s32 4294967295, %s731_s9   ;;  %p705_p0 = scmp.ge.s32.totalorder %s731_s9, 1  ;;  %s731_s9 = sphi %s748_s9, %s12_s9  }
   0x2   : > { %p112_p1 = scmp.lt.s32.totalorder %s731_s9, 3 }
   0x4   : > { %p113_p2 = pnand %p705_p0, %p112_p1 }
   0x5   : > { %p133_p3 = scmp.lt.s32.totalorder (!%p113_p2), %s701_s10, 1 }
   0x6   : > { %116 = sbr.rel (%p113_p2) target bundleno = 194 (0xc2), region = 28 }
   0xb   : > { %v710_v0 = vld [vmem:[%s846_s1 + $0x18] sm:$0xff]  ;;  %v709_v1 = vld [vmem:[%s846_s1 + $0x10] sm:$0xff]  ;;  %v144_v2 = vld [vmem:[%s846_s1 + $0x8] sm:$0xff]  ;;  %s849_s10 = smov (!%p133_p3, %s701_s10), 1  ;;  %vm152_vm0 = vcmask 130048   ;;  %vm646_vm1 = vcmask 55296  }
   0xc   : > { %v169_v3 = vand.u32 4294901760, %v710_v0  ;;  %v765_v4 = vand.u32 4294901760, %v709_v1  ;;  %v767_v5 = vand.u32 4294901760, %v144_v2  ;;  %v143_v6 = vld [vmem:[%s846_s1] sm:$0xff]  ;;  %v713_v7 = vld [vmem:[%s846_s1 + $0x28] sm:$0xff]  ;;  %s716_s23 = smul.u32 24, %s849_s10 }
   0xd   : > { %v777_v8 = vand.u32 4294901760, %v143_v6  ;;  %v779_v9 = vand.u32 4294901760, %v713_v7  ;;  %v712_v10 = vld [vmem:[%s846_s1 + $0x20] sm:$0xff]  ;;  %s707_s27 = sshll.u32 %s849_s10, 3 }
   0xe   : > { %v197_v11 = vsub.f32 %v710_v0, %v169_v3  ;;  %v203_v12 = vsub.f32 %v709_v1, %v765_v4  ;;  %254 = vmatpush.msra.mxu3 %v169_v3  ;;  %170 = vmatpush.msra.mxu0 %v169_v3  ;;  %v786_v13 = vsub.f32 %v144_v2, %v767_v5  ;;  %v794_v18 = vand.u32 4294901760, %v712_v10  ;;  %s799_s26 = scalar_lea.vmem %s845_s0, %s716_s23  ;;  %s141_s30 = scalar_lea.vmem %s847_s2, %s707_s27 }
   0xf   : > { %v790_v14 = vsub.f32 %v143_v6, %v777_v8  ;;  %v804_v20 = vsub.f32 %v713_v7, %v779_v9  ;;  %v142_v21 = vld [vmem:[%s799_s26] sm:$0xff]  ;;  %v708_v22 = vld [vmem:[%s799_s26 + $0x8] sm:$0xff]  ;;  %v711_v45 = vld [vmem:[%s799_s26 + $0x10] sm:$0xff] }
  0x10   : > { %229 = vmatpush.msra.mxu2 %v197_v11  ;;  %v198_v15 = vand.u32 4294901760, %v197_v11  ;;  %256 = vmatpush.msra.mxu3 %v765_v4  ;;  %v204_v16 = vand.u32 4294901760, %v203_v12  ;;  %v361_v17 = vand.u32 4294901760, %v786_v13  ;;  %v151_v26 = vrot.slane %v708_v22, 1 }
  0x11   : > { %172 = vmatpush.msra.mxu0 %v765_v4  ;;  %v367_v19 = vand.u32 4294901760, %v790_v14  ;;  %v315_v27 = vrot.slane %v142_v21, 1  ;;  %v812_v32 = vsub.f32 %v712_v10, %v794_v18  ;;  %v529_v38 = vand.u32 4294901760, %v804_v20 }
  0x12   : > { %232 = vmatpush.msra.mxu2 %v203_v12  ;;  %v199_v23 = vsub.f32 %v197_v11, %v198_v15  ;;  %v205_v24 = vsub.f32 %v203_v12, %v204_v16  ;;  %v362_v25 = vsub.f32 %v786_v13, %v361_v17  ;;  %v153_v33 = vsel %vm152_vm0, %v151_v26, 0 }
  0x13   : > { %281 = vmatpush.msrb.mxu0 %v198_v15  ;;  %v368_v28 = vsub.f32 %v790_v14, %v367_v19  ;;  %v316_v34 = vsel %vm152_vm0, %v315_v27, 0  ;;  %v173_v36 = vand.u32 4294901760, %v153_v33  ;;  %v535_v41 = vand.u32 4294901760, %v812_v32 }
  0x14   : > { %333 = vmatpush.msrb.mxu2 %v767_v5  ;;  %v200_v29 = vand.u32 4294901760, %v199_v23  ;;  %v206_v30 = vand.u32 4294901760, %v205_v24  ;;  %v363_v31 = vand.u32 4294901760, %v362_v25  ;;  %v336_v37 = vand.u32 4294901760, %v316_v34 }
  0x15   : > { %285 = vmatpush.msrb.mxu0 %v204_v16  ;;  %v369_v35 = vand.u32 4294901760, %v368_v28  ;;  %v174_v39 = vsub.f32 %v153_v33, %v173_v36  ;;  %v530_v44 = vsub.f32 %v804_v20, %v529_v38  ;;  %v536_v48 = vsub.f32 %v812_v32, %v535_v41 }
  0x16   : > { %335 = vmatpush.msrb.mxu2 %v777_v8  ;;  %201 = vmatpush.msra.mxu1 %v200_v29  ;;  %v337_v40 = vsub.f32 %v316_v34, %v336_v37  ;;  %v483_v49 = vrot.slane %v711_v45, 1 }
  0x17   : > { %364 = vmatpush.msrb.mxu3 %v363_v31  ;;  %235 = vmatmul.f32.vlgmr.msra.gmra.mxu2 %v174_v39  ;;  %v175_v42 = vand.u32 4294901760, %v174_v39  ;;  %v531_v52 = vand.u32 4294901760, %v530_v44  ;;  %v537_v53 = vand.u32 4294901760, %v536_v48 }
  0x18   : > { %207 = vmatpush.msra.mxu1 %v206_v30  ;;  %v338_v43 = vand.u32 4294901760, %v337_v40  ;;  %444 = vmatpush.msra.mxu2 %v361_v17  ;;  %v484_v54 = vsel %vm152_vm0, %v483_v49, 0 }
  0x19   : > { %370 = vmatpush.msrb.mxu3 %v369_v35  ;;  %209 = vmatmul.f32.vlgmr.msra.gmra.mxu1 %v173_v36  ;;  %v176_v46 = vsub.f32 %v174_v39, %v175_v42  ;;  %v504_v55 = vand.u32 4294901760, %v484_v54 }
  0x1a   : > { %306 = vmatpush.msrb.mxu1 %v169_v3  ;;  %260 = vmatmul.f32.vlgmr.msra.gmra.mxu3 %v175_v42  ;;  %v339_v47 = vsub.f32 %v337_v40, %v338_v43 }
  0x1b   : > { %469 = vmatpush.msra.mxu3 %v767_v5  ;;  %v177_v50 = vand.u32 4294901760, %v176_v46  ;;  %448 = vmatpush.msra.mxu2 %v367_v19  ;;  %v505_v56 = vsub.f32 %v484_v54, %v504_v55 }
  0x1c   : > { %308 = vmatpush.msrb.mxu1 %v765_v4  ;;  %v340_v51 = vand.u32 4294901760, %v339_v47 }
  0x1d   : > { %471 = vmatpush.msra.mxu3 %v777_v8  ;;  %178 = vmatmul.f32.vlgmr.msra.gmra.mxu0 %v177_v50  ;;  %v506_v57 = vand.u32 4294901760, %v505_v56 }
  0x1e   : > { %417 = vmatpush.msra.mxu1 %v767_v5  ;;  %392 = vmatpush.msra.mxu0 %v786_v13 }
  0x1f   : > { %341 = vmatmul.f32.vlgmr.msrb.gmra.mxu2 %v340_v51  ;;  %v507_v58 = vsub.f32 %v505_v56, %v506_v57 }
  0x20   : > { %419 = vmatpush.msra.mxu1 %v777_v8  ;;  %395 = vmatpush.msra.mxu0 %v790_v14 }
  0x21   : > { %310 = vmatmul.f32.vlgmr.msrb.gmra.mxu1 %v173_v36  ;;  %560 = vmatpush.msrb.mxu2 %v804_v20  ;;  %v508_v59 = vand.u32 4294901760, %v507_v58 }
  0x22   : > { %532 = vmatpush.msrb.mxu1 %v531_v52  ;;  %372 = vmatmul.f32.vlgmr.msrb.gmra.mxu3 %v336_v37 }
  0x23   : > { %585 = vmatpush.msrb.mxu3 %v779_v9  ;;  %563 = vmatpush.msrb.mxu2 %v812_v32 }
  0x24   : > { %538 = vmatpush.msrb.mxu1 %v537_v53 }
  0x25   : > { %587 = vmatpush.msrb.mxu3 %v794_v18  ;;  %287 = vmatmul.f32.vlgmr.msrb.gmra.mxu0 %v173_v36 }
  0x26   : > { %501 = vmatpush.msrb.mxu0 %v779_v9 }
  0x27   : > { %450 = vmatmul.f32.vlgmr.msra.gmra.mxu2 %v336_v37 }
  0x28   : > { %503 = vmatpush.msrb.mxu0 %v794_v18 }
  0x29   : > { %423 = vmatmul.f32.vlgmr.msra.gmra.mxu1 %v338_v43 }
  0x2a   : > { %637 = vmatpush.msra.mxu1 %v779_v9  ;;  %473 = vmatmul.f32.vlgmr.msra.gmra.mxu3 %v336_v37 }
  0x2c   : > { %639 = vmatpush.msra.mxu1 %v794_v18 }
  0x2d   : > { %398 = vmatmul.f32.vlgmr.msra.gmra.mxu0 %v337_v40 }
  0x2e   : > { %612 = vmatpush.msra.mxu0 %v529_v38 }
  0x2f   : > { %566 = vmatmul.f32.vlgmr.msrb.gmra.mxu2 %v505_v56 }
  0x30   : > { %616 = vmatpush.msra.mxu0 %v535_v41 }
  0x31   : > { %540 = vmatmul.f32.vlgmr.msrb.gmra.mxu1 %v504_v55 }
  0x32   : > { %591 = vmatmul.f32.vlgmr.msrb.gmra.mxu3 %v506_v57 }
  0x35   : > { %509 = vmatmul.f32.vlgmr.msrb.gmra.mxu0 %v508_v59 }
  0x39   : > { %641 = vmatmul.f32.vlgmr.msra.gmra.mxu1 %v504_v55 }
  0x3d   : > { %618 = vmatmul.f32.vlgmr.msra.gmra.mxu0 %v504_v55 }
  0x96   : > { %v210_v60 = vpop.f32.mrf.mxu1 }
  0x9a   : > { %v179_v61 = vpop.f32.mrf.mxu0  ;;  %v236_v62 = vpop.f32.mrf.mxu2 }
  0x9b   : > { %v211_v63 = vadd.f32 %v210_v60, %v179_v61 }
  0x9d   : > { %v261_v0 = vpop.f32.mrf.mxu3  ;;  %v237_v2 = vadd.f32 %v236_v62, %v211_v63 }
  0x9e   : > { %v311_v1 = vpop.f32.mrf.mxu1 }
  0x9f   : > { %v262_v3 = vadd.f32 %v261_v0, %v237_v2 }
  0xa2   : > { %v288_v4 = vpop.f32.mrf.mxu0  ;;  %v342_v5 = vpop.f32.mrf.mxu2 }
  0xa3   : > { %v289_v6 = vadd.f32 %v288_v4, %v262_v3 }
  0xa5   : > { %v373_v7 = vpop.f32.mrf.mxu3  ;;  %v312_v8 = vadd.f32 %v311_v1, %v289_v6 }
  0xa6   : > { %v424_v9 = vpop.f32.mrf.mxu1 }
  0xa7   : > { %v343_v10 = vadd.f32 %v342_v5, %v312_v8 }
  0xa9   : > { %v374_v14 = vadd.f32 %v373_v7, %v343_v10 }
  0xaa   : > { %v399_v11 = vpop.f32.mrf.mxu0  ;;  %v451_v12 = vpop.f32.mrf.mxu2 }
  0xab   : > { %v400_v16 = vadd.f32 %v399_v11, %v374_v14 }
  0xad   : > { %v474_v13 = vpop.f32.mrf.mxu3  ;;  %v425_v20 = vadd.f32 %v424_v9, %v400_v16 }
  0xae   : > { %v541_v15 = vpop.f32.mrf.mxu1 }
  0xaf   : > { %v452_v23 = vadd.f32 %v451_v12, %v425_v20 }
  0xb1   : > { %v475_v28 = vadd.f32 %v474_v13, %v452_v23 }
  0xb2   : > { %v510_v17 = vpop.f32.mrf.mxu0  ;;  %v567_v18 = vpop.f32.mrf.mxu2 }
  0xb3   : > { %v542_v19 = vadd.f32 %v541_v15, %v510_v17 }
  0xb5   : > { %v568_v21 = vadd.f32 %v567_v18, %v542_v19  ;;  %v592_v22 = vpop.f32.mrf.mxu3 }
  0xb6   : > { %v642_v26 = vpop.f32.mrf.mxu1 }
  0xb7   : > { %v593_v24 = vadd.f32 %v592_v22, %v568_v21 }
  0xba   : > { %v619_v25 = vpop.f32.mrf.mxu0 }
  0xbb   : > { %v620_v27 = vadd.f32 %v619_v25, %v593_v24 }
  0xbd   : > { %v643_v29 = vadd.f32 %v642_v26, %v620_v27 }
  0xbf   : > { %v645_v30 = vadd.f32 %v643_v29, %v475_v28 }
  0xc1   : > { %647 = vst.msk [vmem:[%s141_s30] sm:$0x7f] %vm646_vm1, %v645_v30 }
  0xc2 PF: > { %s12_s9 = sadd.s32 1, %s731_s9  }
  0xc3   : > { %p9_p4 = scmp.ge.s32.totalorder %s12_s9, 4  }
  0xc5   :  { %11 = sbr.rel (!%p9_p4) target bundleno = 1 (0x1), region = 62 }

</bundles_post_ra>
